<compile_context>
chip_gen: v7x
topology: tpu7x:2x2x1
jax: 0.10.0
libtpu: 0.0.40
codegen_flags: <defaults>
</compile_context>

<pallas_src>
import jax
import jax.numpy as jnp
from jax import lax
from jax.experimental import pallas as pl
from jax.experimental.pallas import tpu as pltpu

IN_FEATURES = 768
OUT_FEATURES = 2
DEFAULT_BLOCK_B = 2048   # 2 x (2048*768*4B) feat + 2 x (2048*128*4B) out ~= 14 MiB: fits v5e's 16 MiB
MAX_BLOCK_B = 4096       # ceiling so double-buffered feat (+padded out) stays far under v7x's 64 MiB/TC


def _round_up(x, m):
    return ((x + m - 1) // m) * m


def _classifier_kernel(x_ref, w_ref, b_ref, o_ref):
    # Hot path: (TB, 768) x (2, 768)^T matmul on the MXU (f32 accumulation)
    # + bias broadcast add.
    x = x_ref[...]   # (TB, 768) feat dtype (f32 or bf16)
    w = w_ref[...]   # (2, 768)  same dtype as feat (PyTorch nn.Linear layout)
    b = b_ref[...]   # (1, 2)    f32
    acc = lax.dot_general(
        x, w,
        dimension_numbers=(((1,), (1,)), ((), ())),   # contract feature dims: x @ w.T
        preferred_element_type=jnp.float32,
    )                                                 # (TB, 2) f32
    o_ref[...] = (acc + b).astype(o_ref.dtype)


def _choose_tile(batch, block_b):
    """Batch tile that (a) satisfies the (8,128) rule and (b) gives >=2 grid
    steps whenever there is enough work for both v7x TensorCores."""
    if batch <= 8:
        return batch                       # full-array block (always legal)
    if batch <= 2 * block_b:
        # Two roughly-equal steps so both v7x TCs get work (no-op on v5e/v6e).
        return min(_round_up(pl.cdiv(batch, 2), 8), batch)
    return block_b


def addn_classifier_forward(feat, weight, bias, *, block_b=DEFAULT_BLOCK_B):
    """feat: (B, 768) f32 or bf16; weight: (2, 768) f32 (PyTorch layout); bias: (2,) f32.

    Returns f32 logits of shape (B, 2).
    """
    if block_b > MAX_BLOCK_B or block_b % 8 != 0:
        raise ValueError(
            f"block_b must be a multiple of 8 and <= {MAX_BLOCK_B} "
            f"(v7x VMEM ceiling); got {block_b}")

    B = feat.shape[0]
    tb = _choose_tile(B, block_b)
    grid = (pl.cdiv(B, tb),)

    itemsize = jnp.dtype(feat.dtype).itemsize
    # Cast the (tiny) weight to the feat dtype once in the wrapper; accumulation
    # stays f32 inside the kernel, bias is added in f32.
    w = weight.astype(feat.dtype)
    b2d = bias.astype(jnp.float32).reshape(1, OUT_FEATURES)

    # VMEM budget for the chosen tile (double-buffered feat, lane-padded f32
    # output, sublane-padded weight/bias) + headroom for internal scratch.
    vmem_bytes = (
        2 * tb * IN_FEATURES * itemsize       # feat, double-buffered
        + 2 * tb * 128 * 4                    # (tb, 2) out padded to (tb, 128) f32, double-buffered
        + 2 * 8 * IN_FEATURES * itemsize      # weight padded to (8, 768)
        + 2 * 8 * 128 * 4                     # bias padded to (8, 128)
    )
    vmem_limit = min(vmem_bytes + (4 << 20), 60 << 20)   # always < v7x 64 MiB/TC

    cost = pl.CostEstimate(
        flops=2 * B * IN_FEATURES * OUT_FEATURES,
        transcendentals=0,
        bytes_accessed=(B * IN_FEATURES * itemsize          # feat read
                        + B * OUT_FEATURES * 4               # logits written
                        + OUT_FEATURES * IN_FEATURES * itemsize
                        + OUT_FEATURES * 4),
    )

    return pl.pallas_call(
        _classifier_kernel,
        out_shape=jax.ShapeDtypeStruct((B, OUT_FEATURES), jnp.float32),
        grid_spec=pltpu.PrefetchScalarGridSpec(
            num_scalar_prefetch=0,
            grid=grid,
            in_specs=[
                # feat: tiled along batch, auto double-buffered by the pipeline.
                pl.BlockSpec((tb, IN_FEATURES), lambda i: (i, 0)),
                # weight / bias: constant index_map -> stays VMEM-resident.
                pl.BlockSpec((OUT_FEATURES, IN_FEATURES), lambda i: (0, 0)),
                pl.BlockSpec((1, OUT_FEATURES), lambda i: (0, 0)),
            ],
            out_specs=pl.BlockSpec((tb, OUT_FEATURES), lambda i: (i, 0)),
        ),
        compiler_params=pltpu.CompilerParams(
            # Batch axis is embarrassingly parallel: lets v7x shard it across
            # its two TensorCores; harmless no-op on single-TC v5e/v6e.
            dimension_semantics=("parallel",),
            vmem_limit_bytes=int(vmem_limit),
        ),
        cost_estimate=cost,
    )(feat, w, b2d)


def _reference_forward(feat, weight, bias):
    return feat.astype(jnp.float32) @ weight.astype(jnp.float32).T + bias[None, :]


if __name__ == "__main__":
    key = jax.random.PRNGKey(0)
    k_feat, k_w, k_b = jax.random.split(key, 3)

    # Deterministic parameter init mimicking nn.Linear's uniform(-1/sqrt(in), 1/sqrt(in)).
    bound = 1.0 / (IN_FEATURES ** 0.5)
    weight = jax.random.uniform(
        k_w, (OUT_FEATURES, IN_FEATURES), dtype=jnp.float32,
        minval=-bound, maxval=bound)
    bias = jax.random.uniform(
        k_b, (OUT_FEATURES,), dtype=jnp.float32, minval=-bound, maxval=bound)

    # Case 1: small batch -> single full-array block (f32 path, exact).
    B1 = 8
    feat1 = jax.random.normal(k_feat, (B1, IN_FEATURES), dtype=jnp.float32)
    out1 = jax.block_until_ready(addn_classifier_forward(feat1, weight, bias))
    ref1 = _reference_forward(feat1, weight, bias)
    assert out1.shape == (B1, OUT_FEATURES), out1.shape
    assert jnp.allclose(out1, ref1, atol=1e-4, rtol=1e-4), "mismatch vs reference (B=8)"

    # Case 2: tiled path with the even 2-step split (tb=104, ragged last block).
    B2 = 200
    feat2 = jax.random.normal(k_feat, (B2, IN_FEATURES), dtype=jnp.float32)
    out2 = jax.block_until_ready(
        addn_classifier_forward(feat2, weight, bias, block_b=128))
    ref2 = _reference_forward(feat2, weight, bias)
    assert out2.shape == (B2, OUT_FEATURES), out2.shape
    assert jnp.allclose(out2, ref2, atol=1e-4, rtol=1e-4), "mismatch vs reference (B=200, tiled)"

    # Case 3: bf16 feat fast path (half the HBM traffic), f32 accumulation.
    B3 = 64
    feat3 = jax.random.normal(k_feat, (B3, IN_FEATURES), dtype=jnp.float32).astype(jnp.bfloat16)
    out3 = jax.block_until_ready(addn_classifier_forward(feat3, weight, bias))
    ref3 = _reference_forward(feat3, weight, bias)   # f32 reference on bf16-cast inputs
    assert out3.shape == (B3, OUT_FEATURES), out3.shape
    assert out3.dtype == jnp.float32, out3.dtype
    assert jnp.allclose(out3, ref3, atol=3e-2, rtol=3e-2), "mismatch vs reference (B=64, bf16)"

    print("KERNEL_OK")
</pallas_src>

<mosaic_0001>
module attributes {stable_mosaic.version = 11 : i64} {
  func.func @_classifier_kernel(%arg0: i32, %arg1: memref<8x768xf32, #tpu.memory_space<vmem>>, %arg2: memref<2x768xf32, #tpu.memory_space<vmem>>, %arg3: memref<1x2xf32, #tpu.memory_space<vmem>>, %arg4: memref<8x2xf32, #tpu.memory_space<vmem>>) attributes {dimension_semantics = [#tpu.dimension_semantics<parallel>], iteration_bounds = array<i64: 1>, scalar_prefetch = 0 : i64, scratch_operands = 0 : i64, tpu.core_type = #tpu.core_type<tc>, window_params = [{transform_indices = @transform_0, window_bounds = array<i64: 8, 768>}, {pipeline_mode = #tpu.pipeline_mode<synchronous>, transform_indices = @transform_1, window_bounds = array<i64: 2, 768>}, {pipeline_mode = #tpu.pipeline_mode<synchronous>, transform_indices = @transform_2, window_bounds = array<i64: 1, 2>}, {transform_indices = @transform_3, window_bounds = array<i64: 8, 2>}]} {
    %c0 = arith.constant 0 : index
    %c0_0 = arith.constant 0 : index
    %0 = vector.load %arg1[%c0, %c0_0] : memref<8x768xf32, #tpu.memory_space<vmem>>, vector<8x768xf32>
    %c0_1 = arith.constant 0 : index
    %c0_2 = arith.constant 0 : index
    %1 = vector.load %arg2[%c0_1, %c0_2] : memref<2x768xf32, #tpu.memory_space<vmem>>, vector<2x768xf32>
    %c0_3 = arith.constant 0 : index
    %c0_4 = arith.constant 0 : index
    %2 = vector.load %arg3[%c0_3, %c0_4] : memref<1x2xf32, #tpu.memory_space<vmem>>, vector<1x2xf32>
    %cst = arith.constant dense<0.000000e+00> : vector<8x2xf32>
    %3 = tpu.matmul %0, %1, %cst {dimension_numbers = #tpu.dot_dimension_numbers<[1], [1], [0], [0], [0, 0, 1, 0], [], []>} : vector<8x768xf32>, vector<2x768xf32>, vector<8x2xf32> -> vector<8x2xf32>
    %4 = vector.broadcast %2 : vector<1x2xf32> to vector<8x2xf32>
    %5 = arith.addf %3, %4 : vector<8x2xf32>
    %c0_5 = arith.constant 0 : index
    %c0_6 = arith.constant 0 : index
    %6 = vector.load %arg4[%c0_5, %c0_6] : memref<8x2xf32, #tpu.memory_space<vmem>>, vector<8x2xf32>
    tpu.vector_store %arg4[%c0_5, %c0_6], %5 {strides = array<i32>} : memref<8x2xf32, #tpu.memory_space<vmem>>, vector<8x2xf32>,
    return
  }
  func.func @transform_0(%arg0: i32) -> (i32, i32) {
    %c0_i32 = arith.constant 0 : i32
    %c0_i32_0 = arith.constant 0 : i32
    return %arg0, %c0_i32 : i32, i32
  }
  func.func @transform_1(%arg0: i32) -> (i32, i32) {
    %c0_i32 = arith.constant 0 : i32
    %c0_i32_0 = arith.constant 0 : i32
    %c0_i32_1 = arith.constant 0 : i32
    return %c0_i32, %c0_i32_0 : i32, i32
  }
  func.func @transform_2(%arg0: i32) -> (i32, i32) {
    %c0_i32 = arith.constant 0 : i32
    %c0_i32_0 = arith.constant 0 : i32
    %c0_i32_1 = arith.constant 0 : i32
    return %c0_i32, %c0_i32_0 : i32, i32
  }
  func.func @transform_3(%arg0: i32) -> (i32, i32) {
    %c0_i32 = arith.constant 0 : i32
    %c0_i32_0 = arith.constant 0 : i32
    return %arg0, %c0_i32 : i32, i32
  }
}

</mosaic_0001>

<bundles_post_ra>
// kernel: tpu_custom_call.1
= control target key start
LH: loop header
LB: loop body
LE: loop exit
PB: predicated region body
PF: predicated region fallthrough
CT: control target
= control target key end

     0   :  { %8 = vsyncpa [#allocation3], 0  ;;  %s415_s0 = inlined_call_operand.hbm [shape: f32[8,768], index: 0, kind: input, shape index: {}]   ;;  %s416_s1 = inlined_call_operand.hbm [shape: f32[2,768], index: 1, kind: input, shape index: {}]   ;;  %s417_s2 = inlined_call_operand.vmem [shape: f32[1,2], index: 2, kind: input, shape index: {}]   ;;  %s418_s3 = inlined_call_operand.vmem [shape: f32[8,2], index: 3, kind: output, shape index: {}]  }
   0x1   :  { %9 = vsyncpa [#allocation5], 0  ;;  %s362_s12 = smov [#allocation2]   ;;  %s363_s14 = smov [#allocation4]  }
   0x2   :  { %s16_s13 = sshll.u32 %s362_s12, 4  ;;  %s26_s15 = sshll.u32 %s363_s14, 4  ;;  %s17_s13 = int_to_ptr.vmem [resolvable:$true] %s16_s13  ;;  %s27_s15 = int_to_ptr.vmem [resolvable:$true] %s26_s15 }
   0x3   :  { %s314_s18 = scalar_lea.hbm %s415_s0, 768 }
   0x4   :  { %p315_p0 = scmp.ne.s32.totalorder %s415_s0, %s314_s18  ;;  %p318_p1 = scmp.lt.u32.totalorder %s314_s18, %s415_s0 }
   0x6   :  { %p320_p2 = pnand %p318_p1, %p315_p0 }
   0x8   :  { %323 = shalt.err (!%p320_p2)
}
   0x9   :  { %s324_s23 = scalar_lea.vmem %s17_s13, 768  ;;  %p329_p4 = scmp.lt.s32.totalorder %s17_s13, %s17_s13 }
   0xa   :  { %p325_p3 = scmp.ne.s32.totalorder %s17_s13, %s324_s23  ;;  %p330_p5 = scmp.lt.s32.totalorder %s324_s23, %s324_s23 }
   0xc   :  { %p331_p6 = por %p330_p5, %p329_p4 }
   0xe   :  { %p332_p7 = pnand %p331_p6, %p325_p3 }
  0x10   :  { %335 = shalt.err (!%p332_p7)
}
  0x11   :  { %19 = dma.hbm_to_vmem [thread:$0]  %s415_s0, 768, %s17_s13, [#allocation3]  }
  0x12   :  { %s336_s28 = scalar_lea.hbm %s416_s1, 192 }
  0x13   :  { %p337_p8 = scmp.ne.s32.totalorder %s416_s1, %s336_s28  ;;  %p340_p9 = scmp.lt.u32.totalorder %s336_s28, %s416_s1 }
  0x15   :  { %p342_p10 = pnand %p340_p9, %p337_p8 }
  0x17   :  { %345 = shalt.err (!%p342_p10)
}
  0x18   :  { %s346_s6 = scalar_lea.vmem %s27_s15, 192  ;;  %p351_p12 = scmp.lt.s32.totalorder %s27_s15, %s27_s15 }
  0x19   :  { %p347_p11 = scmp.ne.s32.totalorder %s27_s15, %s346_s6  ;;  %p352_p13 = scmp.lt.s32.totalorder %s346_s6, %s346_s6 }
  0x1b   :  { %p353_p0 = por %p352_p13, %p351_p12 }
  0x1d   :  { %p354_p1 = pnand %p353_p0, %p347_p11 }
  0x1f   :  { %357 = shalt.err (!%p354_p1)
}
  0x20   :  { %29 = dma.hbm_to_vmem [thread:$0]  %s416_s1, 192, %s27_s15, [#allocation5]  }
  0x21   :  { %358 = dma.done.wait [#allocation3], 768  }
  0x22   :  { %359 = vsyncadd [#allocation3], 4294966528 }
  0x23   :  { %360 = dma.done.wait [#allocation5], 192  }
  0x24   :  { %361 = vsyncadd [#allocation5], 4294967104  ;;  %v59_v0 = vlaneseq  ;;  %v364_v1 = vmov 1983009808   ;;  %v44_v6 = vld [vmem:[#allocation4] sm:$0xff]  ;;  %v41_v7 = vld [vmem:[#allocation2 + $0x18] sm:$0xff] }
  0x25   :  { %v57_v2 = vunpack.c.l.s4 %v364_v1  ;;  %v55_v8 = vcombine.high %v44_v6, %v44_v6  ;;  %220 = vmatprep.mubr.f32.mxu0 %v41_v7  ;;  %v39_v10 = vld [vmem:[#allocation2 + $0x8] sm:$0xff]  ;;  %v305_v11 = vld.sshfl [vmem:[#allocation4 + $0x8] sm:$0x33 pattern:$0x76325410]  ;;  %v38_v16 = vld [vmem:[#allocation2] sm:$0xff] }
  0x26   :  { %v60_v3 = vshrl.u32 %v59_v0, 7  ;;  %150 = vmatprep.mubr.f32.mxu1 %v39_v10  ;;  %v79_v15 = vcombine.high %v305_v11, %v305_v11  ;;  %v40_v17 = vld [vmem:[#allocation2 + $0x10] sm:$0xff]  ;;  %v43_v18 = vld [vmem:[#allocation2 + $0x28] sm:$0xff]  ;;  %v42_v19 = vld [vmem:[#allocation2 + $0x20] sm:$0xff]  ;;  %vm296_vm0 = vcmask 15360  }
  0x27   :  { %v58_v4 = vunpack.c.0.s8 %v57_v2  ;;  %v304_v22 = vld [vmem:[%s417_s2] ss:$0 sm:$0xff] }
  0x29   :  { %v61_v5 = vsub.s32 %v58_v4, %v60_v3 }
  0x2b   :  { %v62_v9 = vrot.slane %v44_v6, %v61_v5  ;;  %v69_v12 = vrot.slane %v55_v8, %v61_v5 }
  0x2d   :  { %v70_v13 = vcombine.high %v62_v9, %v62_v9  ;;  %v71_v14 = vcombine.high %v69_v12, %v69_v12 }
  0x2f   :  { %86 = vmatprep.subr.mxu1 %v70_v13  ;;  %156 = vmatprep.subr.mxu0 %v71_v14 }
  0x30   :  { %87 = vmatpush1.xpose.msra.mxu1 %v62_v9  ;;  %157 = vmatpush1.xpose.msra.mxu0 %v69_v12 }
  0x31   :  { %226 = vmatprep.subr.mxu0 %v79_v15 }
  0x33   :  { %151 = vmatmul.mubr.f32.vlgmr.msra.gmra.mrb[0].mxu1 %v38_v16  ;;  %221 = vmatmul.mubr.f32.vlgmr.msra.gmra.mrb[0].mxu0 %v40_v17 }
  0x34   :  { %227 = vmatpush1.xpose.msra.mxu0 %v305_v11  ;;  %290 = vmatprep.mubr.f32.mxu0 %v43_v18 }
  0x3b   :  { %291 = vmatmul.mubr.f32.vlgmr.msra.gmra.mrb[0].mxu0 %v42_v19 }
 0x106   :  { %v152_v20 = vpop.f32.mrb[0].mxu1 }
 0x107   :  { %v154_v21 = vpop.f32.mrb[1].mxu1  ;;  %v153_v23 = vadd.f32 %v304_v22, %v152_v20 }
 0x10e   :  { %v292_v24 = vpop.f32.mrb[0].mxu0 }
 0x10f   :  { %v307_v25 = vadd.f32 %v292_v24, %v153_v23  ;;  %v294_v26 = vpop.f32.mrb[1].mxu0 }
 0x111   :  { %297 = vst.msk [vmem:[%s418_s3] sm:$0xff] %vm296_vm0, %v307_v25 }
 0x112   :  { %302 = vsyncpa [#allocation3], 1 }
 0x113   :  { %303 = vsyncpa [#allocation5], 1 }

</bundles_post_ra>
